<compile_context>
chip_gen: v7x
topology: tpu7x:2x2x1
jax: 0.10.0
libtpu: 0.0.40
codegen_flags: <defaults>
</compile_context>

<pallas_src>
import functools

import numpy as np
import jax
import jax.numpy as jnp
from jax import lax
from jax.experimental import pallas as pl
from jax.experimental.pallas import tpu as pltpu

_BIG = 1e30       # plain Python float -> jaxpr literal, never a captured constant
_OUT_LANES = 128


def _edit_distance_kernel(max_len_ref,                       # SMEM (n_tiles,) i32 (prefetch)
                          ref_pad_ref, hyp_ref, ref_len_ref, hyp_len_ref,
                          out_ref,
                          *, ins_cost, del_cost, sub_cost, n_ref):
    """Batched Levenshtein DP over one batch tile.

    ref_pad_ref : (TILE_N, Lp)  i32 -- ref token for DP column j at lane j
                                       (lane 0 / tail lanes = -1 sentinel)
    hyp_ref     : (TILE_N, Hp)  i32 -- hyp token ids (padded lanes = -2)
    ref_len_ref : (TILE_N, 1)   i32 -- effective ref lengths (after eos)
    hyp_len_ref : (TILE_N, 1)   i32 -- effective hyp lengths (after eos)
    out_ref     : (TILE_N, 128) f32 -- distance broadcast across lanes
    """
    tile_n, lp = ref_pad_ref.shape
    _, hp = hyp_ref.shape
    _, out_lanes = out_ref.shape

    ref_tok = ref_pad_ref[...]                       # (TILE_N, Lp) i32
    hyp_tok = hyp_ref[...]                           # (TILE_N, Hp) i32
    ref_len = ref_len_ref[...]                       # (TILE_N, 1)  i32
    hyp_len = hyp_len_ref[...]                       # (TILE_N, 1)  i32

    # ---- loop-invariant tensors (small: TILE_N right-sized for Lp) ----------
    ji = lax.broadcasted_iota(jnp.int32, (tile_n, lp), 1)     # lane / ref-column index
    jdl = ji.astype(jnp.float32) * del_cost                   # j * del_cost
    # substitution cost with the j==0 diag-killer folded in:
    sub_zero = jnp.where(ji == 0, _BIG, 0.0)                  # cost on token match
    sub_sub = sub_zero + sub_cost                             # cost on mismatch

    # Doubling prefix-min only needs to cover the real ref extent (R+1 columns).
    shifts = []
    s = 1
    while s < pl.next_power_of_2(n_ref + 1):
        shifts.append(s)
        s *= 2

    # d[0][j] = j * del_cost (delete all ref tokens)
    row0 = jdl

    def step(i, carry):
        row, h_cur = carry
        # hyp token at position i sits at lane 0 of the rolled carry
        t = h_cur[:, 0:1]                                      # (TILE_N, 1) i32
        sub_eff = jnp.where(ref_tok == t, sub_zero, sub_sub)   # (TILE_N, Lp) f32

        # diag[j] = d[i][j-1]; at j == 0 the diag term is invalid (sub_eff has +BIG),
        # so cand[0] = row[0] + ins = (i+1) * ins_cost (correct boundary).
        diag = pltpu.roll(row, shift=1, axis=1)
        cand = jnp.minimum(row + ins_cost, diag + sub_eff)

        # min-plus prefix scan along lanes, as a prefix-min of m = cand - j*del.
        # Wrap-around lanes are masked inline against the live `ji` iota
        # (no hoisted bias constants -> no spill traffic in the hot loop).
        m = cand - jdl
        for sh in shifts:
            rolled = pltpu.roll(m, shift=sh, axis=1)
            m = jnp.minimum(m, jnp.where(ji >= sh, rolled, _BIG))
        new_row = m + jdl

        # only advance batch rows whose hyp is at least i+1 tokens long
        row = jnp.where(i < hyp_len, new_row, row)
        # bring hyp[i+1] to lane 0 for the next iteration (roll by -1)
        h_next = pltpu.roll(h_cur, shift=hp - 1, axis=1)
        return row, h_next

    # trip count bounded by the per-tile max hyp length (scalar-prefetched)
    max_len = max_len_ref[pl.program_id(0)]
    # TODO(synk): lax.fori_loop only supports `unroll` with static bounds; bucket
    # batch rows by hyp_len in the wrapper if per-step scheduling becomes binding.
    row, _ = lax.fori_loop(0, max_len, step, (row0, hyp_tok))

    # gather d[hyp_len][ref_len] per batch row; lane-dense (unmasked) store
    dist = jnp.sum(jnp.where(ji == ref_len, row, 0.0), axis=1, keepdims=True)
    out_ref[...] = jnp.broadcast_to(dist, (tile_n, out_lanes))


class StringMatchingEditDistance:
    """JAX/Pallas analogue of pydrobert's _StringMatching (edit-distance forward)."""

    def __init__(self, eos=None, include_eos=False, batch_first=True,
                 ins_cost=1.0, del_cost=1.0, sub_cost=1.0, warn=True):
        self.eos = eos
        self.include_eos = include_eos
        self.batch_first = batch_first
        self.ins_cost = float(ins_cost)
        self.del_cost = float(del_cost)
        self.sub_cost = float(sub_cost)
        # TODO(synk): host-side warning about tokens after eos has no Pallas equivalent
        self.warn = warn

    def _seq_lens(self, toks):
        N, T = toks.shape
        if self.eos is None:
            return jnp.full((N,), T, jnp.int32)
        is_eos = toks == self.eos
        any_eos = jnp.any(is_eos, axis=1)
        first = jnp.argmax(is_eos, axis=1)
        lens = jnp.where(any_eos, first + (1 if self.include_eos else 0), T)
        return lens.astype(jnp.int32)

    def __call__(self, ref, hyp):
        if not self.batch_first:          # (T, N) -> (N, T)
            ref = ref.T
            hyp = hyp.T
        ref = ref.astype(jnp.int32)       # tokens stay int32 end-to-end
        hyp = hyp.astype(jnp.int32)
        N, R = ref.shape
        _, H = hyp.shape

        ref_len = self._seq_lens(ref)
        hyp_len = self._seq_lens(hyp)

        # ---- batch tiling --------------------------------------------------
        Lp = max(128, pl.cdiv(R + 1, 128) * 128)   # ref axis padded onto lanes
        Hp = max(128, pl.cdiv(H, 128) * 128)       # hyp axis padded (roll-friendly)

        # TILE_N sized for the 64-vreg file (not VMEM), and capped at ~N/2 so the
        # "parallel" batch grid yields >=2 tiles for v7x's two TensorCores.
        if Lp <= 128:
            tgt = 32
        elif Lp <= 256:
            tgt = 16
        else:
            tgt = 8
        half = ((pl.cdiv(N, 2) + 7) // 8) * 8
        TILE_N = max(8, min(tgt, half))
        n_tiles = pl.cdiv(N, TILE_N)
        N_pad = n_tiles * TILE_N

        # Lane 0 and padded lanes of ref hold a -1 sentinel (never matches a hyp
        # token); padded hyp lanes hold -2 and are masked by hyp_len anyway.
        ref_pad = jnp.full((N_pad, Lp), -1, jnp.int32).at[:N, 1:R + 1].set(ref)
        hyp_pad = jnp.full((N_pad, Hp), -2, jnp.int32).at[:N, :H].set(hyp)
        ref_len_pad = jnp.zeros((N_pad, 1), jnp.int32).at[:N, 0].set(ref_len)
        hyp_len_pad = jnp.zeros((N_pad, 1), jnp.int32).at[:N, 0].set(hyp_len)

        # per-tile max hyp length -> scalar-prefetched loop bound
        max_hyp_per_tile = jnp.max(
            hyp_len_pad[:, 0].reshape(n_tiles, TILE_N), axis=1).astype(jnp.int32)

        kernel = functools.partial(
            _edit_distance_kernel,
            ins_cost=self.ins_cost, del_cost=self.del_cost,
            sub_cost=self.sub_cost, n_ref=R)

        out = pl.pallas_call(
            kernel,
            out_shape=jax.ShapeDtypeStruct((N_pad, _OUT_LANES), jnp.float32),
            grid_spec=pltpu.PrefetchScalarGridSpec(
                num_scalar_prefetch=1,
                grid=(n_tiles,),
                in_specs=[
                    pl.BlockSpec((TILE_N, Lp), lambda n, ml: (n, 0)),
                    pl.BlockSpec((TILE_N, Hp), lambda n, ml: (n, 0)),
                    pl.BlockSpec((TILE_N, 1), lambda n, ml: (n, 0)),
                    pl.BlockSpec((TILE_N, 1), lambda n, ml: (n, 0)),
                ],
                out_specs=pl.BlockSpec((TILE_N, _OUT_LANES), lambda n, ml: (n, 0)),
            ),
            compiler_params=pltpu.CompilerParams(
                dimension_semantics=("parallel",)),
        )(max_hyp_per_tile, ref_pad, hyp_pad, ref_len_pad, hyp_len_pad)

        return out[:N, 0]


def _numpy_reference(ref, hyp, ref_lens, hyp_lens, ins, dl, sb):
    N = ref.shape[0]
    out = np.zeros(N, np.float32)
    for n in range(N):
        r = ref[n, :ref_lens[n]]
        h = hyp[n, :hyp_lens[n]]
        Rn, Hn = len(r), len(h)
        d = np.zeros((Hn + 1, Rn + 1), np.float32)
        d[0, :] = np.arange(Rn + 1) * dl
        d[:, 0] = np.arange(Hn + 1) * ins
        for i in range(1, Hn + 1):
            for j in range(1, Rn + 1):
                c = 0.0 if h[i - 1] == r[j - 1] else sb
                d[i, j] = min(d[i - 1, j] + ins, d[i, j - 1] + dl, d[i - 1, j - 1] + c)
        out[n] = d[Hn, Rn]
    return out


if __name__ == "__main__":
    key = jax.random.PRNGKey(0)
    N, R, H = 2, 8, 10
    EOS = 0

    k1, k2 = jax.random.split(key)
    ref = jax.random.randint(k1, (N, R), 1, 6, dtype=jnp.int32)
    hyp = jax.random.randint(k2, (N, H), 1, 6, dtype=jnp.int32)
    # plant eos markers so eos-truncation logic is exercised
    ref = ref.at[0, 6].set(EOS)
    hyp = hyp.at[1, 7].set(EOS)

    module = StringMatchingEditDistance(
        eos=EOS, include_eos=False, batch_first=True,
        ins_cost=1.0, del_cost=1.0, sub_cost=1.0, warn=True)

    dist = jax.block_until_ready(module(ref, hyp))

    # verify against a plain numpy DP reference
    ref_np = np.asarray(ref)
    hyp_np = np.asarray(hyp)
    ref_lens = np.asarray(module._seq_lens(ref))
    hyp_lens = np.asarray(module._seq_lens(hyp))
    expect = _numpy_reference(ref_np, hyp_np, ref_lens, hyp_lens, 1.0, 1.0, 1.0)
    np.testing.assert_allclose(np.asarray(dist), expect, rtol=0, atol=1e-5)

    print("KERNEL_OK")
</pallas_src>

<mosaic_0001>
module attributes {stable_mosaic.version = 11 : i64} {
  func.func @_edit_distance_kernel(%arg0: i32, %arg1: memref<1xi32, #tpu.memory_space<smem>>, %arg2: memref<8x128xi32, #tpu.memory_space<vmem>>, %arg3: memref<8x128xi32, #tpu.memory_space<vmem>>, %arg4: memref<8x1xi32, #tpu.memory_space<vmem>>, %arg5: memref<8x1xi32, #tpu.memory_space<vmem>>, %arg6: memref<8x128xf32, #tpu.memory_space<vmem>>) attributes {dimension_semantics = [#tpu.dimension_semantics<parallel>], iteration_bounds = array<i64: 1>, scalar_prefetch = 1 : i64, scratch_operands = 0 : i64, tpu.core_type = #tpu.core_type<tc>, window_params = [{transform_indices = @transform_0, window_bounds = array<i64: 8, 128>}, {transform_indices = @transform_1, window_bounds = array<i64: 8, 128>}, {transform_indices = @transform_2, window_bounds = array<i64: 8, 1>}, {transform_indices = @transform_3, window_bounds = array<i64: 8, 1>}, {transform_indices = @transform_4, window_bounds = array<i64: 8, 128>}]} {
    %c0 = arith.constant 0 : index
    %c0_0 = arith.constant 0 : index
    %0 = vector.load %arg2[%c0, %c0_0] : memref<8x128xi32, #tpu.memory_space<vmem>>, vector<8x128xi32>
    %c0_1 = arith.constant 0 : index
    %c0_2 = arith.constant 0 : index
    %1 = vector.load %arg3[%c0_1, %c0_2] : memref<8x128xi32, #tpu.memory_space<vmem>>, vector<8x128xi32>
    %c0_3 = arith.constant 0 : index
    %c0_4 = arith.constant 0 : index
    %2 = vector.load %arg4[%c0_3, %c0_4] : memref<8x1xi32, #tpu.memory_space<vmem>>, vector<8x1xi32>
    %c0_5 = arith.constant 0 : index
    %c0_6 = arith.constant 0 : index
    %3 = vector.load %arg5[%c0_5, %c0_6] : memref<8x1xi32, #tpu.memory_space<vmem>>, vector<8x1xi32>
    %4 = tpu.iota {dimensions = array<i32: 1>} : vector<8x128xi32>
    %5 = arith.sitofp %4 : vector<8x128xi32> to vector<8x128xf32>
    %cst = arith.constant 1.000000e+00 : f32
    %6 = vector.broadcast %cst : f32 to vector<8x128xf32>
    %7 = arith.mulf %5, %6 : vector<8x128xf32>
    %c0_i32 = arith.constant 0 : i32
    %8 = vector.broadcast %c0_i32 : i32 to vector<8x128xi32>
    %9 = arith.cmpi eq, %4, %8 : vector<8x128xi32>
    %cst_7 = arith.constant 1.000000e+30 : f32
    %cst_8 = arith.constant 0.000000e+00 : f32
    %10 = vector.broadcast %cst_7 : f32 to vector<8x128xf32>
    %11 = vector.broadcast %cst_8 : f32 to vector<8x128xf32>
    %12 = arith.select %9, %10, %11 : vector<8x128xi1>, vector<8x128xf32>
    %cst_9 = arith.constant 1.000000e+00 : f32
    %13 = vector.broadcast %cst_9 : f32 to vector<8x128xf32>
    %14 = arith.addf %12, %13 : vector<8x128xf32>
    %15 = arith.index_cast %arg0 : i32 to index
    %16 = memref.load %arg1[%15] : memref<1xi32, #tpu.memory_space<smem>>
    %c0_i32_10 = arith.constant 0 : i32
    %17 = arith.subi %16, %c0_i32_10 : i32
    %18 = arith.addi %c0_i32_10, %17 : i32
    %c1_i32 = arith.constant 1 : i32
    %19:2 = scf.for %arg7 = %c0_i32_10 to %18 step %c1_i32 iter_args(%arg8 = %7, %arg9 = %1) -> (vector<8x128xf32>, vector<8x128xi32>)  : i32 {
      %29 = vector.extract_strided_slice %arg9 {offsets = [0, 0], sizes = [8, 1], strides = [1, 1]} : vector<8x128xi32> to vector<8x1xi32>
      %30 = vector.broadcast %29 : vector<8x1xi32> to vector<8x128xi32>
      %31 = arith.cmpi eq, %0, %30 : vector<8x128xi32>
      %32 = arith.select %31, %12, %14 : vector<8x128xi1>, vector<8x128xf32>
      %c1_i32_15 = arith.constant 1 : i32
      %33 = tpu.dynamic_rotate %arg8 by %c1_i32_15 dim 1 : vector<8x128xf32>, i32 -> vector<8x128xf32>
      %cst_16 = arith.constant 1.000000e+00 : f32
      %34 = vector.broadcast %cst_16 : f32 to vector<8x128xf32>
      %35 = arith.addf %arg8, %34 : vector<8x128xf32>
      %36 = arith.addf %33, %32 : vector<8x128xf32>
      %37 = arith.minimumf %35, %36 : vector<8x128xf32>
      %38 = arith.subf %37, %7 : vector<8x128xf32>
      %c1_i32_17 = arith.constant 1 : i32
      %39 = tpu.dynamic_rotate %38 by %c1_i32_17 dim 1 : vector<8x128xf32>, i32 -> vector<8x128xf32>
      %c1_i32_18 = arith.constant 1 : i32
      %40 = vector.broadcast %c1_i32_18 : i32 to vector<8x128xi32>
      %41 = arith.cmpi sge, %4, %40 : vector<8x128xi32>
      %cst_19 = arith.constant 1.000000e+30 : f32
      %42 = vector.broadcast %cst_19 : f32 to vector<8x128xf32>
      %43 = arith.select %41, %39, %42 : vector<8x128xi1>, vector<8x128xf32>
      %44 = arith.minimumf %38, %43 : vector<8x128xf32>
      %c2_i32 = arith.constant 2 : i32
      %45 = tpu.dynamic_rotate %44 by %c2_i32 dim 1 : vector<8x128xf32>, i32 -> vector<8x128xf32>
      %c2_i32_20 = arith.constant 2 : i32
      %46 = vector.broadcast %c2_i32_20 : i32 to vector<8x128xi32>
      %47 = arith.cmpi sge, %4, %46 : vector<8x128xi32>
      %cst_21 = arith.constant 1.000000e+30 : f32
      %48 = vector.broadcast %cst_21 : f32 to vector<8x128xf32>
      %49 = arith.select %47, %45, %48 : vector<8x128xi1>, vector<8x128xf32>
      %50 = arith.minimumf %44, %49 : vector<8x128xf32>
      %c4_i32 = arith.constant 4 : i32
      %51 = tpu.dynamic_rotate %50 by %c4_i32 dim 1 : vector<8x128xf32>, i32 -> vector<8x128xf32>
      %c4_i32_22 = arith.constant 4 : i32
      %52 = vector.broadcast %c4_i32_22 : i32 to vector<8x128xi32>
      %53 = arith.cmpi sge, %4, %52 : vector<8x128xi32>
      %cst_23 = arith.constant 1.000000e+30 : f32
      %54 = vector.broadcast %cst_23 : f32 to vector<8x128xf32>
      %55 = arith.select %53, %51, %54 : vector<8x128xi1>, vector<8x128xf32>
      %56 = arith.minimumf %50, %55 : vector<8x128xf32>
      %c8_i32 = arith.constant 8 : i32
      %57 = tpu.dynamic_rotate %56 by %c8_i32 dim 1 : vector<8x128xf32>, i32 -> vector<8x128xf32>
      %c8_i32_24 = arith.constant 8 : i32
      %58 = vector.broadcast %c8_i32_24 : i32 to vector<8x128xi32>
      %59 = arith.cmpi sge, %4, %58 : vector<8x128xi32>
      %cst_25 = arith.constant 1.000000e+30 : f32
      %60 = vector.broadcast %cst_25 : f32 to vector<8x128xf32>
      %61 = arith.select %59, %57, %60 : vector<8x128xi1>, vector<8x128xf32>
      %62 = arith.minimumf %56, %61 : vector<8x128xf32>
      %63 = arith.addf %62, %7 : vector<8x128xf32>
      %64 = vector.broadcast %arg7 : i32 to vector<8x1xi32>
      %65 = arith.cmpi slt, %64, %3 : vector<8x1xi32>
      %66 = vector.shape_cast %65 : vector<8x1xi1> to vector<8x1xi1>
      %67 = vector.broadcast %66 : vector<8x1xi1> to vector<8x128xi1>
      %68 = arith.select %67, %63, %arg8 : vector<8x128xi1>, vector<8x128xf32>
      %c127_i32 = arith.constant 127 : i32
      %69 = tpu.dynamic_rotate %arg9 by %c127_i32 dim 1 : vector<8x128xi32>, i32 -> vector<8x128xi32>
      scf.yield %68, %69 : vector<8x128xf32>, vector<8x128xi32>
    }
    %20 = vector.broadcast %2 : vector<8x1xi32> to vector<8x128xi32>
    %21 = arith.cmpi eq, %4, %20 : vector<8x128xi32>
    %cst_11 = arith.constant 0.000000e+00 : f32
    %22 = vector.broadcast %cst_11 : f32 to vector<8x128xf32>
    %23 = arith.select %21, %19#0, %22 : vector<8x128xi1>, vector<8x128xf32>
    %cst_12 = arith.constant dense<0.000000e+00> : vector<8xf32>
    %24 = vector.multi_reduction <add>, %23, %cst_12 [1] : vector<8x128xf32> to vector<8xf32>
    %25 = vector.shape_cast %24 : vector<8xf32> to vector<8x1xf32>
    %26 = vector.shape_cast %25 : vector<8x1xf32> to vector<8x1xf32>
    %27 = vector.broadcast %26 : vector<8x1xf32> to vector<8x128xf32>
    %c0_13 = arith.constant 0 : index
    %c0_14 = arith.constant 0 : index
    %28 = vector.load %arg6[%c0_13, %c0_14] : memref<8x128xf32, #tpu.memory_space<vmem>>, vector<8x128xf32>
    tpu.vector_store %arg6[%c0_13, %c0_14], %27 {strides = array<i32>} : memref<8x128xf32, #tpu.memory_space<vmem>>, vector<8x128xf32>,
    return
  }
  func.func @transform_0(%arg0: i32, %arg1: memref<1xi32, #tpu.memory_space<smem>>) -> (i32, i32) {
    %c0_i32 = arith.constant 0 : i32
    %c0_i32_0 = arith.constant 0 : i32
    return %arg0, %c0_i32 : i32, i32
  }
  func.func @transform_1(%arg0: i32, %arg1: memref<1xi32, #tpu.memory_space<smem>>) -> (i32, i32) {
    %c0_i32 = arith.constant 0 : i32
    %c0_i32_0 = arith.constant 0 : i32
    return %arg0, %c0_i32 : i32, i32
  }
  func.func @transform_2(%arg0: i32, %arg1: memref<1xi32, #tpu.memory_space<smem>>) -> (i32, i32) {
    %c0_i32 = arith.constant 0 : i32
    %c0_i32_0 = arith.constant 0 : i32
    return %arg0, %c0_i32 : i32, i32
  }
  func.func @transform_3(%arg0: i32, %arg1: memref<1xi32, #tpu.memory_space<smem>>) -> (i32, i32) {
    %c0_i32 = arith.constant 0 : i32
    %c0_i32_0 = arith.constant 0 : i32
    return %arg0, %c0_i32 : i32, i32
  }
  func.func @transform_4(%arg0: i32, %arg1: memref<1xi32, #tpu.memory_space<smem>>) -> (i32, i32) {
    %c0_i32 = arith.constant 0 : i32
    %c0_i32_0 = arith.constant 0 : i32
    return %arg0, %c0_i32 : i32, i32
  }
}

</mosaic_0001>

<bundles_post_ra>
// kernel: tpu_custom_call.1
= control target key start
LH: loop header
LB: loop body
LE: loop exit
PB: predicated region body
PF: predicated region fallthrough
CT: control target
= control target key end

     0   :  { %11 = vsyncpa [#allocation5], 0  ;;  %v24_v2 = vlaneseq  ;;  %v215_v7 = vmov 0.0   ;;  %s329_s0 = inlined_call_operand.<no memory space> [shape: s32[1], index: 0, kind: input, shape index: {}]   ;;  %s330_s1 = inlined_call_operand.vmem [shape: s32[8,128], index: 1, kind: input, shape index: {}]   ;;  %s331_s2 = inlined_call_operand.vmem [shape: s32[8,128], index: 2, kind: input, shape index: {}]   ;;  %s332_s3 = inlined_call_operand.vmem [shape: s32[8,1], index: 3, kind: input, shape index: {}]   ;;  %s333_s4 = inlined_call_operand.vmem [shape: s32[8,1], index: 4, kind: input, shape index: {}]   ;;  %s334_s5 = inlined_call_operand.hbm [shape: f32[8,128], index: 5, kind: output, shape index: {}]  }
   0x1   :  { %v257_v0 = vld [vmem:[%s330_s1] sm:$0xff]  ;;  %p114_p0 = scmp.le.s32.totalorder %s329_s0, 0 }
   0x2   :  { %v21_v1 = vld [vmem:[%s331_s2] sm:$0xff]   ;;  %v272_v5 = vand.u32 127, %v24_v2 }
   0x3   :  { %v265_v3 = vld [vmem:[%s332_s3] sm:$0xff]  ;;  %107 = sbr.rel (%p114_p0) target bundleno = 626 (0x272), region = 37  ;;  %v199_v11 = vmov (!%p114_p0), %v21_v1   ;;  %s290_s3 = smov (!%p114_p0), 0  }
   0x4   :  { %v270_v4 = vld [vmem:[%s333_s4] sm:$0xff]  ;;  %v275_v6 = vcvt.s32.f32 %v272_v5   ;;  %vm27_vm0 = vcmp.eq.s32.totalorder %v272_v5, 0 }
   0x5   :  { %v278_v8 = vsel %vm27_vm0, 1e+30, %v215_v7 }
   0x6   :  { %v281_v9 = vadd.f32 1.0, %v278_v8  ;;  %v335_v10 = vmov %v275_v6  ;;  %v203_v12 = vmov (!%p114_p0), %v275_v6  }
   0xa LB: > { %v216_v13 = vmov 0   ;;  %s217_s4 = smov 1   ;;  %v46_v15 = vadd.f32 1.0, %v205_v12  ;;  %vm52_vm2 = vcmp.ge.s32.totalorder %v272_v5, 1  ;;  %v71_v21 = vstv %s209_s3  ;;  %s218_s26 = smov 2   ;;  %s209_s3 = sphi %s290_s3, %s34_s3   ;;  %v205_v12 = vphi %v203_v12, %v204_v12   ;;  %v201_v11 = vphi %v199_v11, %v80_v11  }
   0xb   : > { %156 = vset.pattern.permute.xlu0 %v216_v13  ;;  %157 = vset.pattern.permute.xlu1 %v216_v13  ;;  %vm72_vm3 = vcmp.lt.s32.totalorder %v71_v21, %v270_v4  ;;  %s219_s27 = smov 127   ;;  %vm57_vm4 = vcmp.ge.s32.totalorder %v272_v5, 2  ;;  %s220_s28 = smov 4   ;;  %vm62_vm5 = vcmp.ge.s32.totalorder %v272_v5, 4  ;;  %vm67_vm6 = vcmp.ge.s32.totalorder %v272_v5, 8 }
   0xc   : > { %40 = vperm.xlu0 %156, %v201_v11   ;;  %v73_v25 = vsel %vm72_vm3, 1, %v216_v13  ;;  %s221_s29 = smov 8   ;;  %s34_s3 = sadd.s32 1, %s209_s3  }
   0xd   : > { %p33_p1 = scmp.ge.s32.totalorder %s34_s3, %s329_s0 }
  0x10   : > { %44 = vrot.lane.b32.xlu0 %v205_v12, %s217_s4 }
  0x8b   : > { %v41_v14 = vpop.permute.xlu0 %40 }
  0x8c   : > { %vm42_vm1 = vcmp.eq.s32.totalorder %v257_v0, %v41_v14 }
  0x8d   : > { %v43_v16 = vsel %vm42_vm1, %v278_v8, %v281_v9 }
  0x8f   : > { %v45_v17 = vpop.permute.xlu0 %44 }
  0x90   : > { %v47_v18 = vadd.f32 %v45_v17, %v43_v16 }
  0x92   : > { %v48_v19 = vmin.f32 %v46_v15, %v47_v18 }
  0x94   : > { %v49_v20 = vsub.f32 %v48_v19, %v275_v6 }
  0x96   : > { %50 = vrot.lane.b32.xlu1 %v49_v20, %s217_s4 }
 0x108   : > { %v51_v22 = vpop.permute.xlu1 %50 }
 0x109   : > { %v53_v23 = vsel %vm52_vm2, %v51_v22, 1e+30 }
 0x10a   : > { %v54_v24 = vmin.f32 %v49_v20, %v53_v23 }
 0x10c   : > { %55 = vrot.lane.b32.xlu1 %v54_v24, %s218_s26 }
 0x110   : > { %75 = vperm.xlu1 %157, %v73_v25  }
 0x114   : > { %79 = vrot.lane.b32.xlu1 %v201_v11, %s219_s27 }
 0x17e   : > { %v56_v26 = vpop.permute.xlu1 %55 }
 0x17f   : > { %v58_v27 = vsel %vm57_vm4, %v56_v26, 1e+30 }
 0x180   : > { %v59_v28 = vmin.f32 %v54_v24, %v58_v27 }
 0x182   : > { %60 = vrot.lane.b32.xlu0 %v59_v28, %s220_s28 }
 0x18f   : > { %v76_v29 = vpop.permute.xlu1 %75 }
 0x190   : > { %vm77_vm7 = vcmp.eq.s32.totalorder %v76_v29, 1 }
 0x193   : > { %v80_v11 = vpop.permute.xlu1 %79  }
 0x1f4   : > { %v61_v30 = vpop.permute.xlu0 %60 }
 0x1f5   : > { %v63_v31 = vsel %vm62_vm5, %v61_v30, 1e+30 }
 0x1f6   : > { %v64_v32 = vmin.f32 %v59_v28, %v63_v31 }
 0x1f8   : > { %65 = vrot.lane.b32.xlu0 %v64_v32, %s221_s29 }
 0x26a   : > { %v66_v33 = vpop.permute.xlu0 %65 }
 0x26b   : > { %v68_v34 = vsel %vm67_vm6, %v66_v33, 1e+30  ;;  %36 = sbr.rel (!%p33_p1) target bundleno = 10 (0xa), region = 43 }
 0x26c   : > { %v69_v35 = vmin.f32 %v64_v32, %v68_v34 }
 0x26e   : > { %v70_v36 = vadd.f32 %v69_v35, %v275_v6 }
 0x270   : > { %v78_v37 = vsel %vm77_vm7, %v70_v36, %v205_v12  }
 0x271   : > { %v204_v12 = vmov %v78_v37   ;;  %v336_v10 = vmov (%p33_p1), %v78_v37 }
 0x272 PF:  { %v222_v38 = vmov 0   ;;  %s223_s7 = smov [#allocation4]   ;;  %v213_v10 = vphi %v335_v10, %v336_v10  }
 0x273   :  { %158 = vset.pattern.permute.xlu0 %v222_v38  ;;  %s95_s8 = sshll.u32 %s223_s7, 4  ;;  %s96_s8 = int_to_ptr.vmem [resolvable:$true] %s95_s8 }
 0x274   :  { %82 = vperm.xlu0 %158, %v265_v3   ;;  %s159_s0 = scalar_lea.vmem %s96_s8, 128  ;;  %p164_p3 = scmp.lt.s32.totalorder %s96_s8, %s96_s8 }
 0x275   :  { %p160_p2 = scmp.ne.s32.totalorder %s96_s8, %s159_s0  ;;  %p165_p4 = scmp.lt.s32.totalorder %s159_s0, %s159_s0 }
 0x277   :  { %p166_p5 = por %p165_p4, %p164_p3 }
 0x279   :  { %p167_p6 = pnand %p166_p5, %p160_p2 }
 0x2f3   :  { %v83_v39 = vpop.permute.xlu0 %82 }
 0x2f4   :  { %vm84_vm8 = vcmp.eq.s32.totalorder %v272_v5, %v83_v39 }
 0x2f5   :  { %v85_v40 = vsel %vm84_vm8, %v213_v10, 0.0 }
 0x2f6   :  { %86 = vadd.xlane.f32.xlu0 %v85_v40 }
 0x383   :  { %v87_v41 = vpop.xlane.xlu0 %86 }
 0x384   :  { %88 = vst [vmem:[#allocation4] sm:$0xff] %v87_v41 }
 0x385   :  { %170 = shalt.err (!%p167_p6)
}
 0x386   :  { %s171_s11 = scalar_lea.hbm %s334_s5, 128 }
 0x387   :  { %p172_p7 = scmp.ne.s32.totalorder %s334_s5, %s171_s11  ;;  %p175_p8 = scmp.lt.u32.totalorder %s171_s11, %s334_s5 }
 0x389   :  { %p177_p9 = pnand %p175_p8, %p172_p7 }
 0x38b   :  { %180 = shalt.err (!%p177_p9)
}
 0x38c   :  { %98 = dma.vmem_to_hbm [thread:$0]  %s96_s8, 128, %s334_s5, [#allocation5]  }
 0x38d   :  { %197 = dma.done.wait [#allocation5], 128  }
 0x38e   :  { %198 = vsyncadd [#allocation5], 4294967168 }
 0x38f   :  { %102 = vsyncpa [#allocation5], 1 }

</bundles_post_ra>
